<compile_context>
chip_gen: v6e
topology: v6e:2x2x1
jax: 0.10.0
libtpu: 0.0.40
codegen_flags: <defaults>
</compile_context>

<pallas_src>
import functools

import jax
import jax.numpy as jnp
from jax.experimental import pallas as pl
from jax.experimental.pallas import tpu as pltpu

_MIB = 1024 * 1024
_STREAM_THRESHOLD_BYTES = 8 * _MIB  # hidden stack bigger than this -> stream per layer


def _round_up(a, b):
    return (a + b - 1) // b * b


def _sigmoid(z):
    # One EUP transcendental (tanh) + cheap VALU mul/add; mathematically exact.
    return 0.5 * (jnp.tanh(0.5 * z) + 1.0)


# --------------------------------------------------------------------------
# Kernels
# --------------------------------------------------------------------------
def mlp_kernel_resident(*refs, depth):
    """1-D grid over batch tiles; full hidden-weight stack resident in VMEM."""
    if depth > 0:
        (x_ref, w_in_ref, b_in_ref, w_hid_ref, b_hid_ref,
         w_out_ref, b_out_ref, o_ref) = refs
    else:
        x_ref, w_in_ref, b_in_ref, w_out_ref, b_out_ref, o_ref = refs
        w_hid_ref = b_hid_ref = None

    # input layer: Linear only (matches the reference forward)
    h = jnp.dot(x_ref[...], w_in_ref[...],
                preferred_element_type=jnp.float32) + b_in_ref[...]

    # hidden layers: Linear -> Sigmoid (depth is static -> unrolled)
    for d in range(depth):
        z = jnp.dot(h.astype(w_hid_ref.dtype), w_hid_ref[d],
                    preferred_element_type=jnp.float32) + b_hid_ref[d]
        h = _sigmoid(z)

    # output layer: Linear -> Sigmoid (lane-dense 128-padded store)
    z = jnp.dot(h.astype(w_out_ref.dtype), w_out_ref[...],
                preferred_element_type=jnp.float32) + b_out_ref[...]
    o_ref[...] = _sigmoid(z).astype(o_ref.dtype)


def mlp_kernel_streamed(x_ref, w_in_ref, b_in_ref, w_hid_ref, b_hid_ref,
                        w_out_ref, b_out_ref, o_ref, h_ref):
    """2-D grid (batch tile, hidden layer). One hidden layer of weights is
    resident per step (layer d+1 DMAs while layer d computes); the activation
    is carried across layers in a VMEM scratch accumulator."""
    d = pl.program_id(1)
    nd = pl.num_programs(1)

    @pl.when(d == 0)
    def _():
        h_ref[...] = jnp.dot(x_ref[...], w_in_ref[...],
                             preferred_element_type=jnp.float32) + b_in_ref[...]

    z = jnp.dot(h_ref[...].astype(w_hid_ref.dtype), w_hid_ref[0],
                preferred_element_type=jnp.float32) + b_hid_ref[0]
    h_ref[...] = _sigmoid(z)

    @pl.when(d == nd - 1)
    def _():
        zo = jnp.dot(h_ref[...].astype(w_out_ref.dtype), w_out_ref[...],
                     preferred_element_type=jnp.float32) + b_out_ref[...]
        o_ref[...] = _sigmoid(zo).astype(o_ref.dtype)


# --------------------------------------------------------------------------
# Wrapper
# --------------------------------------------------------------------------
def pad_params(params, *, depth, use_bf16=True):
    """Pad/cast parameters ONCE, outside the per-call path.

    Weights are stored (in_features, out_features) so every layer is x @ W + b
    (== PyTorch Linear's x @ weight.T + bias). Feature dims are zero-padded to
    multiples of 128 (lane-dense); zero padded rows/cols + zero biases keep
    the padding mathematically inert."""
    w_in, b_in, w_hid, b_hid, w_out, b_out = params
    F, H = w_in.shape
    C = w_out.shape[1]
    F_pad, H_pad, C_pad = (_round_up(v, 128) for v in (F, H, C))
    cdt = jnp.bfloat16 if use_bf16 else jnp.float32

    w_in_p = jnp.zeros((F_pad, H_pad), cdt).at[:F, :H].set(w_in.astype(cdt))
    b_in_p = jnp.zeros((1, H_pad), jnp.float32).at[:, :H].set(
        jnp.asarray(b_in, jnp.float32).reshape(1, H))
    w_out_p = jnp.zeros((H_pad, C_pad), cdt).at[:H, :C].set(w_out.astype(cdt))
    b_out_p = jnp.zeros((1, C_pad), jnp.float32).at[:, :C].set(
        jnp.asarray(b_out, jnp.float32).reshape(1, C))
    if depth > 0:
        w_hid_p = jnp.zeros((depth, H_pad, H_pad), cdt).at[:, :H, :H].set(
            w_hid.astype(cdt))
        b_hid_p = jnp.zeros((depth, 1, H_pad), jnp.float32).at[:, 0, :H].set(
            jnp.asarray(b_hid, jnp.float32))
    else:
        w_hid_p = b_hid_p = None
    return (w_in_p, b_in_p, w_hid_p, b_hid_p, w_out_p, b_out_p), (F, H, C)


def _vmem_limit_bytes(tb, F_pad, H_pad, C_pad, depth, stream, cbytes):
    fb = 4  # f32 bytes
    b = 2 * tb * F_pad * cbytes            # x tile (double-buffered)
    b += 2 * F_pad * H_pad * cbytes        # w_in  (grid-invariant, 2 bufs)
    b += 2 * 8 * H_pad * fb                # b_in  (sublane-padded)
    if depth > 0:
        if stream:
            b += 2 * H_pad * H_pad * cbytes    # one hidden layer, double-buffered
            b += 2 * 8 * H_pad * fb
            b += tb * H_pad * fb               # activation carry scratch
        else:
            b += 2 * depth * H_pad * H_pad * cbytes
            b += 2 * depth * 8 * H_pad * fb
    b += 2 * H_pad * C_pad * cbytes        # w_out
    b += 2 * 8 * C_pad * fb                # b_out
    b += 2 * tb * C_pad * fb               # output tile (f32)
    b = int(b * 1.3)                       # slack
    return min(max(b, 16 * _MIB), 100 * _MIB)


def net_forward(x, padded_params, dims, *, depth, tile_b=512, stream_hidden=None):
    w_in_p, b_in_p, w_hid_p, b_hid_p, w_out_p, b_out_p = padded_params
    F, H, C = dims
    B = x.shape[0]
    assert x.shape[1] == F
    F_pad, H_pad = w_in_p.shape
    C_pad = w_out_p.shape[1]
    cdt = w_in_p.dtype
    cbytes = cdt.itemsize

    # Batch tiling: one big tile for small batches (the grid is a serial loop
    # on v5e/v6e); multiples of 16 rows so bf16 activations fill (16,128) tiles.
    # Large batches naturally split into multiple "parallel" tiles (v7x 2-TC).
    tb = max(16, _round_up(min(int(tile_b), B), 16))
    B_pad = _round_up(B, tb)
    grid_b = B_pad // tb

    # Only materialize a padded copy of x when actually needed.
    if (B_pad, F_pad) != (B, F) or x.dtype != cdt:
        x_p = jnp.zeros((B_pad, F_pad), cdt).at[:B, :F].set(x.astype(cdt))
    else:
        x_p = x

    hid_bytes = (depth * H_pad * H_pad * cbytes) if depth > 0 else 0
    stream = (hid_bytes > _STREAM_THRESHOLD_BYTES) if stream_hidden is None \
        else bool(stream_hidden)
    stream = stream and depth > 0

    vmem_limit = _vmem_limit_bytes(tb, F_pad, H_pad, C_pad, depth, stream, cbytes)
    out_shape = jax.ShapeDtypeStruct((B_pad, C_pad), jnp.float32)

    if stream:
        # ---- per-layer hidden-weight streaming (big depth*H^2) ----
        in_specs = [
            pl.BlockSpec((tb, F_pad), lambda i, d: (i, 0)),        # x (invariant in d)
            pl.BlockSpec((F_pad, H_pad), lambda i, d: (0, 0)),     # w_in
            pl.BlockSpec((1, H_pad), lambda i, d: (0, 0)),         # b_in
            pl.BlockSpec((1, H_pad, H_pad), lambda i, d: (d, 0, 0)),  # w_hid[d]
            pl.BlockSpec((1, 1, H_pad), lambda i, d: (d, 0, 0)),      # b_hid[d]
            pl.BlockSpec((H_pad, C_pad), lambda i, d: (0, 0)),     # w_out
            pl.BlockSpec((1, C_pad), lambda i, d: (0, 0)),         # b_out
        ]
        out_specs = pl.BlockSpec((tb, C_pad), lambda i, d: (i, 0))
        call = pl.pallas_call(
            mlp_kernel_streamed,
            out_shape=out_shape,
            grid_spec=pltpu.PrefetchScalarGridSpec(
                num_scalar_prefetch=0,
                grid=(grid_b, depth),
                in_specs=in_specs,
                out_specs=out_specs,
                scratch_shapes=[pltpu.VMEM((tb, H_pad), jnp.float32)]),
            compiler_params=pltpu.CompilerParams(
                dimension_semantics=("parallel", "arbitrary"),
                vmem_limit_bytes=vmem_limit),
        )
        out_pad = call(x_p, w_in_p, b_in_p, w_hid_p, b_hid_p, w_out_p, b_out_p)
    else:
        # ---- fully-resident weights (small hidden stack) ----
        in_specs = [
            pl.BlockSpec((tb, F_pad), lambda i: (i, 0)),           # x
            pl.BlockSpec((F_pad, H_pad), lambda i: (0, 0)),        # w_in
            pl.BlockSpec((1, H_pad), lambda i: (0, 0)),            # b_in
        ]
        args = [x_p, w_in_p, b_in_p]
        if depth > 0:
            in_specs += [
                pl.BlockSpec((depth, H_pad, H_pad), lambda i: (0, 0, 0)),
                pl.BlockSpec((depth, 1, H_pad), lambda i: (0, 0, 0)),
            ]
            args += [w_hid_p, b_hid_p]
        in_specs += [
            pl.BlockSpec((H_pad, C_pad), lambda i: (0, 0)),        # w_out
            pl.BlockSpec((1, C_pad), lambda i: (0, 0)),            # b_out
        ]
        args += [w_out_p, b_out_p]
        out_specs = pl.BlockSpec((tb, C_pad), lambda i: (i, 0))
        call = pl.pallas_call(
            functools.partial(mlp_kernel_resident, depth=depth),
            out_shape=out_shape,
            grid_spec=pltpu.PrefetchScalarGridSpec(
                num_scalar_prefetch=0,
                grid=(grid_b,),
                in_specs=in_specs,
                out_specs=out_specs),
            compiler_params=pltpu.CompilerParams(
                dimension_semantics=("parallel",),
                vmem_limit_bytes=vmem_limit),
        )
        out_pad = call(*args)

    return out_pad[:B, :C].astype(x.dtype)


# --------------------------------------------------------------------------
# Init + pure-JAX reference
# --------------------------------------------------------------------------
def init_params(key, nb_input_params, hidden, depth, channels):
    ks = jax.random.split(key, 6)
    scale = 0.1
    w_in = scale * jax.random.normal(ks[0], (nb_input_params, hidden), jnp.float32)
    b_in = scale * jax.random.normal(ks[1], (1, hidden), jnp.float32)
    if depth > 0:
        w_hid = scale * jax.random.normal(ks[2], (depth, hidden, hidden), jnp.float32)
        b_hid = scale * jax.random.normal(ks[3], (depth, hidden), jnp.float32)
    else:
        w_hid, b_hid = None, None
    w_out = scale * jax.random.normal(ks[4], (hidden, channels), jnp.float32)
    b_out = scale * jax.random.normal(ks[5], (1, channels), jnp.float32)
    return (w_in, b_in, w_hid, b_hid, w_out, b_out)


def net_forward_ref(x, params, *, depth):
    w_in, b_in, w_hid, b_hid, w_out, b_out = params
    h = x @ w_in + b_in
    for d in range(depth):
        h = jax.nn.sigmoid(h @ w_hid[d] + b_hid[d][None, :])
    return jax.nn.sigmoid(h @ w_out + b_out)


if __name__ == "__main__":
    # small, forward-consistent shapes
    depth = 2
    nb_input_params = 16       # settings.nb_input_params
    nb_neurons_per_layer = 32  # constructor arg
    channels = 4               # settings.channels
    batch = 8

    key = jax.random.PRNGKey(0)
    k_x, k_p = jax.random.split(key)
    x = jax.random.normal(k_x, (batch, nb_input_params), jnp.float32)

    params = init_params(k_p, nb_input_params, nb_neurons_per_layer, depth, channels)
    padded, dims = pad_params(params, depth=depth)   # padded/cast once at init
    ref = net_forward_ref(x, params, depth=depth)

    # default (resident-weights) path
    out = jax.block_until_ready(net_forward(x, padded, dims, depth=depth))
    assert out.shape == (batch, channels)
    assert jnp.allclose(out, ref, atol=2e-2, rtol=2e-2), \
        float(jnp.max(jnp.abs(out - ref)))

    # per-layer streamed path (used automatically for large depth*H^2 / v7x VMEM)
    out_s = jax.block_until_ready(
        net_forward(x, padded, dims, depth=depth, stream_hidden=True))
    assert jnp.allclose(out_s, ref, atol=2e-2, rtol=2e-2), \
        float(jnp.max(jnp.abs(out_s - ref)))

    # depth == 0 variant (input layer -> output layer + sigmoid only)
    params0 = init_params(k_p, nb_input_params, nb_neurons_per_layer, 0, channels)
    padded0, dims0 = pad_params(params0, depth=0)
    ref0 = net_forward_ref(x, params0, depth=0)
    out0 = jax.block_until_ready(net_forward(x, padded0, dims0, depth=0))
    assert jnp.allclose(out0, ref0, atol=2e-2, rtol=2e-2), \
        float(jnp.max(jnp.abs(out0 - ref0)))

    print("KERNEL_OK")
</pallas_src>

<mosaic_0001>
module attributes {stable_mosaic.version = 11 : i64} {
  func.func @mlp_kernel_resident(%arg0: i32, %arg1: memref<16x128xbf16, #tpu.memory_space<vmem>>, %arg2: memref<128x128xbf16, #tpu.memory_space<vmem>>, %arg3: memref<1x128xf32, #tpu.memory_space<vmem>>, %arg4: memref<2x128x128xbf16, #tpu.memory_space<vmem>>, %arg5: memref<2x1x128xf32, #tpu.memory_space<vmem>>, %arg6: memref<128x128xbf16, #tpu.memory_space<vmem>>, %arg7: memref<1x128xf32, #tpu.memory_space<vmem>>, %arg8: memref<16x128xf32, #tpu.memory_space<vmem>>) attributes {dimension_semantics = [#tpu.dimension_semantics<parallel>], iteration_bounds = array<i64: 1>, scalar_prefetch = 0 : i64, scratch_operands = 0 : i64, tpu.core_type = #tpu.core_type<tc>, window_params = [{transform_indices = @transform_0, window_bounds = array<i64: 16, 128>}, {pipeline_mode = #tpu.pipeline_mode<synchronous>, transform_indices = @transform_1, window_bounds = array<i64: 128, 128>}, {pipeline_mode = #tpu.pipeline_mode<synchronous>, transform_indices = @transform_2, window_bounds = array<i64: 1, 128>}, {pipeline_mode = #tpu.pipeline_mode<synchronous>, transform_indices = @transform_3, window_bounds = array<i64: 2, 128, 128>}, {pipeline_mode = #tpu.pipeline_mode<synchronous>, transform_indices = @transform_4, window_bounds = array<i64: 2, 1, 128>}, {pipeline_mode = #tpu.pipeline_mode<synchronous>, transform_indices = @transform_5, window_bounds = array<i64: 128, 128>}, {pipeline_mode = #tpu.pipeline_mode<synchronous>, transform_indices = @transform_6, window_bounds = array<i64: 1, 128>}, {transform_indices = @transform_7, window_bounds = array<i64: 16, 128>}]} {
    %c0 = arith.constant 0 : index
    %c0_0 = arith.constant 0 : index
    %0 = vector.load %arg1[%c0, %c0_0] : memref<16x128xbf16, #tpu.memory_space<vmem>>, vector<16x128xbf16>
    %c0_1 = arith.constant 0 : index
    %c0_2 = arith.constant 0 : index
    %1 = vector.load %arg2[%c0_1, %c0_2] : memref<128x128xbf16, #tpu.memory_space<vmem>>, vector<128x128xbf16>
    %cst = arith.constant dense<0.000000e+00> : vector<16x128xf32>
    %2 = tpu.matmul %0, %1, %cst {dimension_numbers = #tpu.dot_dimension_numbers<[1], [0], [0], [1], [0, 0, 1, 1], [], []>} : vector<16x128xbf16>, vector<128x128xbf16>, vector<16x128xf32> -> vector<16x128xf32>
    %c0_3 = arith.constant 0 : index
    %c0_4 = arith.constant 0 : index
    %3 = vector.load %arg3[%c0_3, %c0_4] : memref<1x128xf32, #tpu.memory_space<vmem>>, vector<1x128xf32>
    %4 = vector.broadcast %3 : vector<1x128xf32> to vector<16x128xf32>
    %5 = arith.addf %2, %4 : vector<16x128xf32>
    %6 = arith.truncf %5 : vector<16x128xf32> to vector<16x128xbf16>
    %c0_5 = arith.constant 0 : index
    %c0_6 = arith.constant 0 : index
    %c0_7 = arith.constant 0 : index
    %7 = vector.load %arg4[%c0_5, %c0_6, %c0_7] : memref<2x128x128xbf16, #tpu.memory_space<vmem>>, vector<1x128x128xbf16>
    %8 = vector.shape_cast %7 : vector<1x128x128xbf16> to vector<128x128xbf16>
    %cst_8 = arith.constant dense<0.000000e+00> : vector<16x128xf32>
    %9 = tpu.matmul %6, %8, %cst_8 {dimension_numbers = #tpu.dot_dimension_numbers<[1], [0], [0], [1], [0, 0, 1, 1], [], []>} : vector<16x128xbf16>, vector<128x128xbf16>, vector<16x128xf32> -> vector<16x128xf32>
    %c0_9 = arith.constant 0 : index
    %c0_10 = arith.constant 0 : index
    %c0_11 = arith.constant 0 : index
    %10 = vector.load %arg5[%c0_9, %c0_10, %c0_11] : memref<2x1x128xf32, #tpu.memory_space<vmem>>, vector<1x1x128xf32>
    %11 = vector.shape_cast %10 : vector<1x1x128xf32> to vector<1x128xf32>
    %12 = vector.broadcast %11 : vector<1x128xf32> to vector<16x128xf32>
    %13 = arith.addf %9, %12 : vector<16x128xf32>
    %cst_12 = arith.constant 5.000000e-01 : f32
    %14 = vector.broadcast %cst_12 : f32 to vector<16x128xf32>
    %15 = arith.mulf %14, %13 : vector<16x128xf32>
    %16 = math.tanh %15 : vector<16x128xf32>
    %cst_13 = arith.constant 1.000000e+00 : f32
    %17 = vector.broadcast %cst_13 : f32 to vector<16x128xf32>
    %18 = arith.addf %16, %17 : vector<16x128xf32>
    %cst_14 = arith.constant 5.000000e-01 : f32
    %19 = vector.broadcast %cst_14 : f32 to vector<16x128xf32>
    %20 = arith.mulf %19, %18 : vector<16x128xf32>
    %21 = arith.truncf %20 : vector<16x128xf32> to vector<16x128xbf16>
    %c1 = arith.constant 1 : index
    %c0_15 = arith.constant 0 : index
    %c0_16 = arith.constant 0 : index
    %22 = vector.load %arg4[%c1, %c0_15, %c0_16] : memref<2x128x128xbf16, #tpu.memory_space<vmem>>, vector<1x128x128xbf16>
    %23 = vector.shape_cast %22 : vector<1x128x128xbf16> to vector<128x128xbf16>
    %cst_17 = arith.constant dense<0.000000e+00> : vector<16x128xf32>
    %24 = tpu.matmul %21, %23, %cst_17 {dimension_numbers = #tpu.dot_dimension_numbers<[1], [0], [0], [1], [0, 0, 1, 1], [], []>} : vector<16x128xbf16>, vector<128x128xbf16>, vector<16x128xf32> -> vector<16x128xf32>
    %c1_18 = arith.constant 1 : index
    %c0_19 = arith.constant 0 : index
    %c0_20 = arith.constant 0 : index
    %25 = vector.load %arg5[%c1_18, %c0_19, %c0_20] : memref<2x1x128xf32, #tpu.memory_space<vmem>>, vector<1x1x128xf32>
    %26 = vector.shape_cast %25 : vector<1x1x128xf32> to vector<1x128xf32>
    %27 = vector.broadcast %26 : vector<1x128xf32> to vector<16x128xf32>
    %28 = arith.addf %24, %27 : vector<16x128xf32>
    %cst_21 = arith.constant 5.000000e-01 : f32
    %29 = vector.broadcast %cst_21 : f32 to vector<16x128xf32>
    %30 = arith.mulf %29, %28 : vector<16x128xf32>
    %31 = math.tanh %30 : vector<16x128xf32>
    %cst_22 = arith.constant 1.000000e+00 : f32
    %32 = vector.broadcast %cst_22 : f32 to vector<16x128xf32>
    %33 = arith.addf %31, %32 : vector<16x128xf32>
    %cst_23 = arith.constant 5.000000e-01 : f32
    %34 = vector.broadcast %cst_23 : f32 to vector<16x128xf32>
    %35 = arith.mulf %34, %33 : vector<16x128xf32>
    %36 = arith.truncf %35 : vector<16x128xf32> to vector<16x128xbf16>
    %c0_24 = arith.constant 0 : index
    %c0_25 = arith.constant 0 : index
    %37 = vector.load %arg6[%c0_24, %c0_25] : memref<128x128xbf16, #tpu.memory_space<vmem>>, vector<128x128xbf16>
    %cst_26 = arith.constant dense<0.000000e+00> : vector<16x128xf32>
    %38 = tpu.matmul %36, %37, %cst_26 {dimension_numbers = #tpu.dot_dimension_numbers<[1], [0], [0], [1], [0, 0, 1, 1], [], []>} : vector<16x128xbf16>, vector<128x128xbf16>, vector<16x128xf32> -> vector<16x128xf32>
    %c0_27 = arith.constant 0 : index
    %c0_28 = arith.constant 0 : index
    %39 = vector.load %arg7[%c0_27, %c0_28] : memref<1x128xf32, #tpu.memory_space<vmem>>, vector<1x128xf32>
    %40 = vector.broadcast %39 : vector<1x128xf32> to vector<16x128xf32>
    %41 = arith.addf %38, %40 : vector<16x128xf32>
    %cst_29 = arith.constant 5.000000e-01 : f32
    %42 = vector.broadcast %cst_29 : f32 to vector<16x128xf32>
    %43 = arith.mulf %42, %41 : vector<16x128xf32>
    %44 = math.tanh %43 : vector<16x128xf32>
    %cst_30 = arith.constant 1.000000e+00 : f32
    %45 = vector.broadcast %cst_30 : f32 to vector<16x128xf32>
    %46 = arith.addf %44, %45 : vector<16x128xf32>
    %cst_31 = arith.constant 5.000000e-01 : f32
    %47 = vector.broadcast %cst_31 : f32 to vector<16x128xf32>
    %48 = arith.mulf %47, %46 : vector<16x128xf32>
    %c0_32 = arith.constant 0 : index
    %c0_33 = arith.constant 0 : index
    %49 = vector.load %arg8[%c0_32, %c0_33] : memref<16x128xf32, #tpu.memory_space<vmem>>, vector<16x128xf32>
    tpu.vector_store %arg8[%c0_32, %c0_33], %48 {strides = array<i32>} : memref<16x128xf32, #tpu.memory_space<vmem>>, vector<16x128xf32>,
    return
  }
  func.func @transform_0(%arg0: i32) -> (i32, i32) {
    %c0_i32 = arith.constant 0 : i32
    %c0_i32_0 = arith.constant 0 : i32
    return %arg0, %c0_i32 : i32, i32
  }
  func.func @transform_1(%arg0: i32) -> (i32, i32) {
    %c0_i32 = arith.constant 0 : i32
    %c0_i32_0 = arith.constant 0 : i32
    %c0_i32_1 = arith.constant 0 : i32
    return %c0_i32, %c0_i32_0 : i32, i32
  }
  func.func @transform_2(%arg0: i32) -> (i32, i32) {
    %c0_i32 = arith.constant 0 : i32
    %c0_i32_0 = arith.constant 0 : i32
    %c0_i32_1 = arith.constant 0 : i32
    return %c0_i32, %c0_i32_0 : i32, i32
  }
  func.func @transform_3(%arg0: i32) -> (i32, i32, i32) {
    %c0_i32 = arith.constant 0 : i32
    %c0_i32_0 = arith.constant 0 : i32
    %c0_i32_1 = arith.constant 0 : i32
    %c0_i32_2 = arith.constant 0 : i32
    return %c0_i32, %c0_i32_0, %c0_i32_1 : i32, i32, i32
  }
  func.func @transform_4(%arg0: i32) -> (i32, i32, i32) {
    %c0_i32 = arith.constant 0 : i32
    %c0_i32_0 = arith.constant 0 : i32
    %c0_i32_1 = arith.constant 0 : i32
    %c0_i32_2 = arith.constant 0 : i32
    return %c0_i32, %c0_i32_0, %c0_i32_1 : i32, i32, i32
  }
  func.func @transform_5(%arg0: i32) -> (i32, i32) {
    %c0_i32 = arith.constant 0 : i32
    %c0_i32_0 = arith.constant 0 : i32
    %c0_i32_1 = arith.constant 0 : i32
    return %c0_i32, %c0_i32_0 : i32, i32
  }
  func.func @transform_6(%arg0: i32) -> (i32, i32) {
    %c0_i32 = arith.constant 0 : i32
    %c0_i32_0 = arith.constant 0 : i32
    %c0_i32_1 = arith.constant 0 : i32
    return %c0_i32, %c0_i32_0 : i32, i32
  }
  func.func @transform_7(%arg0: i32) -> (i32, i32) {
    %c0_i32 = arith.constant 0 : i32
    %c0_i32_0 = arith.constant 0 : i32
    return %arg0, %c0_i32 : i32, i32
  }
}

</mosaic_0001>

<bundles_post_ra>
// kernel: tpu_custom_call.1
= control target key start
LH: loop header
LB: loop body
LE: loop exit
PB: predicated region body
PF: predicated region fallthrough
CT: control target
= control target key end

     0   :  { %12 = vsyncpa [#allocation3], 0  ;;  %s1037_s0 = inlined_call_operand.hbm [shape: bf16[16,128], index: 0, kind: input, shape index: {}]   ;;  %s1038_s1 = inlined_call_operand.hbm [shape: bf16[128,128], index: 1, kind: input, shape index: {}]   ;;  %s1039_s2 = inlined_call_operand.vmem [shape: f32[1,128], index: 2, kind: input, shape index: {}]   ;;  %s1040_s3 = inlined_call_operand.hbm [shape: bf16[2,128,128], index: 3, kind: input, shape index: {}]   ;;  %s1041_s4 = inlined_call_operand.vmem [shape: f32[2,1,128], index: 4, kind: input, shape index: {}]   ;;  %s1042_s5 = inlined_call_operand.hbm [shape: bf16[128,128], index: 5, kind: input, shape index: {}]   ;;  %s1043_s6 = inlined_call_operand.vmem [shape: f32[1,128], index: 6, kind: input, shape index: {}]   ;;  %s1044_s7 = inlined_call_operand.hbm [shape: f32[16,128], index: 7, kind: output, shape index: {}]  }
   0x1   :  { %13 = vsyncpa [#allocation6], 0 }
   0x2   :  { %14 = vsyncpa [#allocation9], 0 }
   0x3   :  { %15 = vsyncpa [#allocation4], 0  ;;  %s907_s24 = smov [#allocation5]   ;;  %s908_s26 = smov [#allocation2]  }
   0x4   :  { %s33_s25 = sshll.u32 %s907_s24, 4  ;;  %s21_s27 = sshll.u32 %s908_s26, 4  ;;  %s34_s25 = int_to_ptr.vmem [resolvable:$true] %s33_s25  ;;  %s22_s27 = int_to_ptr.vmem [resolvable:$true] %s21_s27 }
   0x5   :  { %s807_s28 = scalar_lea.vmem %s34_s25, 1024  ;;  %p812_p1 = scmp.lt.s32.totalorder %s34_s25, %s34_s25 }
   0x6   :  { %p808_p0 = scmp.ne.s32.totalorder %s34_s25, %s807_s28  ;;  %p813_p2 = scmp.lt.s32.totalorder %s807_s28, %s807_s28 }
   0x8   :  { %p814_p3 = por %p813_p2, %p812_p1 }
   0xa   :  { %p815_p4 = pnand %p814_p3, %p808_p0 }
   0xc   :  { %818 = shalt.err (!%p815_p4)
}
   0xd   :  { %s909_s29 = smov 64   ;;  %s910_s30 = smov 4  }
   0xe   :  { %39 = dma.hbm_to_vmem [thread:$0]  %s1038_s1, 1024, %s34_s25, [#allocation6], %s909_s29, %s909_s29, %s910_s30  }
   0xf   :  { %s827_s10 = scalar_lea.vmem %s22_s27, 128  ;;  %p832_p6 = scmp.lt.s32.totalorder %s22_s27, %s22_s27 }
  0x10   :  { %p828_p5 = scmp.ne.s32.totalorder %s22_s27, %s827_s10  ;;  %p833_p7 = scmp.lt.s32.totalorder %s827_s10, %s827_s10 }
  0x12   :  { %p834_p8 = por %p833_p7, %p832_p6 }
  0x14   :  { %p835_p9 = pnand %p834_p8, %p828_p5 }
  0x16   :  { %838 = shalt.err (!%p835_p9)
}
  0x17   :  { %27 = dma.hbm_to_vmem [thread:$0]  %s1037_s0, 128, %s22_s27, [#allocation3], %s909_s29, %s909_s29, %s910_s30  }
  0x18   :  { %s911_s13 = smov [#allocation7]   ;;  %s912_s15 = smov [#allocation8]  }
  0x19   :  { %s47_s14 = sshll.u32 %s911_s13, 4  ;;  %s61_s16 = sshll.u32 %s912_s15, 4  ;;  %s48_s14 = int_to_ptr.vmem [resolvable:$true] %s47_s14  ;;  %s62_s16 = int_to_ptr.vmem [resolvable:$true] %s61_s16 }
  0x1a   :  { %s847_s1 = scalar_lea.vmem %s48_s14, 2048  ;;  %p852_p11 = scmp.lt.s32.totalorder %s48_s14, %s48_s14 }
  0x1b   :  { %p848_p10 = scmp.ne.s32.totalorder %s48_s14, %s847_s1  ;;  %p853_p12 = scmp.lt.s32.totalorder %s847_s1, %s847_s1 }
  0x1d   :  { %p854_p13 = por %p853_p12, %p852_p11 }
  0x1f   :  { %p855_p0 = pnand %p854_p13, %p848_p10 }
  0x21   :  { %858 = shalt.err (!%p855_p0)
}
  0x22   :  { %53 = dma.hbm_to_vmem [thread:$0]  %s1040_s3, 2048, %s48_s14, [#allocation6], %s909_s29, %s909_s29, %s910_s30  }
  0x23   :  { %s867_s0 = scalar_lea.vmem %s62_s16, 1024  ;;  %p872_p2 = scmp.lt.s32.totalorder %s62_s16, %s62_s16 }
  0x24   :  { %p868_p1 = scmp.ne.s32.totalorder %s62_s16, %s867_s0  ;;  %p873_p3 = scmp.lt.s32.totalorder %s867_s0, %s867_s0 }
  0x26   :  { %p874_p4 = por %p873_p3, %p872_p2 }
  0x28   :  { %p875_p5 = pnand %p874_p4, %p868_p1 }
  0x2a   :  { %878 = shalt.err (!%p875_p5)
}
  0x2b   :  { %67 = dma.hbm_to_vmem [thread:$0]  %s1042_s5, 1024, %s62_s16, [#allocation9], %s909_s29, %s909_s29, %s910_s30  }
  0x2c   :  { %899 = dma.done.wait [#allocation3], 128  }
  0x2d   :  { %900 = vsyncadd [#allocation3], 4294967168 }
  0x2e   :  { %901 = dma.done.wait [#allocation6], 3072  }
  0x2f   :  { %902 = vsyncadd [#allocation6], 4294964224 }
  0x30   :  { %903 = dma.done.wait [#allocation9], 1024  }
  0x31   :  { %904 = vsyncadd [#allocation9], 4294966272  ;;  %v913_v0 = vmov 0.0   ;;  %vm914_vm0 = vmmov 0   ;;  %v754_v1 = vld [vmem:[#allocation5 + $0x38] sm:$0xff]   ;;  %v755_v2 = vld [vmem:[#allocation5 + $0x30] sm:$0xff]  }
  0x32   :  { %663 = vmatprep.subr.bf16.mxu0 %v913_v0  ;;  %679 = vmatprep.mubr.msk.bf16.mxu0 %vm914_vm0, %v913_v0  ;;  %v756_v3 = vld [vmem:[#allocation5 + $0x28] sm:$0xff]   ;;  %v763_v4 = vld [vmem:[#allocation7 + $0x38] sm:$0xff]   ;;  %v757_v5 = vld [vmem:[#allocation5 + $0x20] sm:$0xff]   ;;  %s915_s25 = smov [#allocation10]  }
  0x33   :  { %683 = vmatprep.subr.bf16.mxu1 %v913_v0  ;;  %699 = vmatprep.mubr.msk.bf16.mxu1 %vm914_vm0, %v913_v0  ;;  %v764_v6 = vld [vmem:[#allocation7 + $0x30] sm:$0xff]   ;;  %v758_v7 = vld [vmem:[#allocation5 + $0x18] sm:$0xff]   ;;  %v765_v8 = vld [vmem:[#allocation7 + $0x28] sm:$0xff]   ;;  %s575_s26 = sshll.u32 %s915_s25, 4  ;;  %s576_s26 = int_to_ptr.vmem [resolvable:$true] %s575_s26 }
  0x34   :  { %664 = vmatpush3.bf16.msra.mxu0 %v754_v1  ;;  %684 = vmatpush3.bf16.msra.mxu1 %v763_v4  ;;  %v759_v9 = vld [vmem:[#allocation5 + $0x10] sm:$0xff]   ;;  %v766_v10 = vld [vmem:[#allocation7 + $0x20] sm:$0xff]   ;;  %v760_v11 = vld [vmem:[#allocation5 + $0x8] sm:$0xff]   ;;  %p884_p7 = scmp.lt.s32.totalorder %s576_s26, %s576_s26 }
  0x35   :  { %665 = vmatprep.subr.bf16.mxu0 %v913_v0  ;;  %685 = vmatprep.subr.bf16.mxu1 %v913_v0  ;;  %v767_v12 = vld [vmem:[#allocation7 + $0x18] sm:$0xff]   ;;  %v761_v13 = vld [vmem:[#allocation5] sm:$0xff]   ;;  %v768_v14 = vld [vmem:[#allocation7 + $0x10] sm:$0xff]  }
  0x36   :  { %v762_v15 = vld [vmem:[#allocation2] sm:$0xff]   ;;  %v769_v16 = vld [vmem:[#allocation7 + $0x8] sm:$0xff]   ;;  %v770_v17 = vld [vmem:[#allocation7] sm:$0xff]  }
  0x37   :  { %v771_v18 = vld [vmem:[#allocation7 + $0x78] sm:$0xff]   ;;  %v772_v27 = vld [vmem:[#allocation7 + $0x70] sm:$0xff]   ;;  %v773_v28 = vld [vmem:[#allocation7 + $0x68] sm:$0xff]  }
  0x38   :  { %666 = vmatpush3.bf16.msra.mxu0 %v755_v2  ;;  %686 = vmatpush3.bf16.msra.mxu1 %v764_v6  ;;  %v589_v20 = vld [vmem:[%s1039_s2] ss:$0 sm:$0xff]  ;;  %v774_v29 = vld [vmem:[#allocation7 + $0x60] sm:$0xff]   ;;  %v776_v31 = vld [vmem:[#allocation7 + $0x50] sm:$0xff]  }
  0x39   :  { %667 = vmatprep.subr.bf16.mxu0 %v913_v0  ;;  %687 = vmatprep.subr.bf16.mxu1 %v913_v0  ;;  %v775_v30 = vld [vmem:[#allocation7 + $0x58] sm:$0xff]   ;;  %v777_v32 = vld [vmem:[#allocation7 + $0x48] sm:$0xff]   ;;  %v778_v33 = vld [vmem:[#allocation7 + $0x40] sm:$0xff]  }
  0x3a   :  { %v779_v34 = vld [vmem:[#allocation8 + $0x38] sm:$0xff]   ;;  %v780_v51 = vld [vmem:[#allocation8 + $0x30] sm:$0xff]   ;;  %v781_v52 = vld [vmem:[#allocation8 + $0x28] sm:$0xff]  }
  0x3b   :  { %v599_v35 = vld [vmem:[%s1041_s4] ss:$0 sm:$0xff]  ;;  %v782_v53 = vld [vmem:[#allocation8 + $0x20] sm:$0xff]   ;;  %v784_v55 = vld [vmem:[#allocation8 + $0x10] sm:$0xff]  }
  0x3c   :  { %668 = vmatpush3.bf16.msra.mxu0 %v756_v3  ;;  %688 = vmatpush3.bf16.msra.mxu1 %v765_v8  ;;  %v783_v54 = vld [vmem:[#allocation8 + $0x18] sm:$0xff]   ;;  %v785_v56 = vld [vmem:[#allocation8 + $0x8] sm:$0xff]   ;;  %v786_v57 = vld [vmem:[#allocation8] sm:$0xff]  }
  0x3d   :  { %669 = vmatprep.subr.bf16.mxu0 %v913_v0  ;;  %689 = vmatprep.subr.bf16.mxu1 %v913_v0  ;;  %v609_v58 = vld [vmem:[%s1041_s4 + $0x1] ss:$0 sm:$0xff] }
  0x40   :  { %670 = vmatpush3.bf16.msra.mxu0 %v757_v5  ;;  %690 = vmatpush3.bf16.msra.mxu1 %v766_v10  ;;  %v618_v10 = vld [vmem:[%s1043_s6] ss:$0 sm:$0xff]  ;;  %s879_s6 = scalar_lea.vmem %s576_s26, 256 }
  0x41   :  { %671 = vmatprep.subr.bf16.mxu0 %v913_v0  ;;  %691 = vmatprep.subr.bf16.mxu1 %v913_v0  ;;  %p880_p6 = scmp.ne.s32.totalorder %s576_s26, %s879_s6  ;;  %p885_p8 = scmp.lt.s32.totalorder %s879_s6, %s879_s6 }
  0x43   :  { %p886_p9 = por %p885_p8, %p884_p7 }
  0x44   :  { %672 = vmatpush3.bf16.msra.mxu0 %v758_v7  ;;  %692 = vmatpush3.bf16.msra.mxu1 %v767_v12 }
  0x45   :  { %673 = vmatprep.subr.bf16.mxu0 %v913_v0  ;;  %693 = vmatprep.subr.bf16.mxu1 %v913_v0  ;;  %p887_p10 = pnand %p886_p9, %p880_p6 }
  0x48   :  { %674 = vmatpush3.bf16.msra.mxu0 %v759_v9  ;;  %694 = vmatpush3.bf16.msra.mxu1 %v768_v14 }
  0x49   :  { %675 = vmatprep.subr.bf16.mxu0 %v913_v0  ;;  %695 = vmatprep.subr.bf16.mxu1 %v913_v0 }
  0x4c   :  { %676 = vmatpush3.bf16.msra.mxu0 %v760_v11  ;;  %696 = vmatpush3.bf16.msra.mxu1 %v769_v16 }
  0x4d   :  { %677 = vmatprep.subr.bf16.mxu0 %v913_v0  ;;  %697 = vmatprep.subr.bf16.mxu1 %v913_v0 }
  0x50   :  { %678 = vmatpush3.bf16.msra.mxu0 %v761_v13  ;;  %698 = vmatpush3.bf16.msra.mxu1 %v770_v17 }
  0x51   :  { %703 = vmatprep.subr.bf16.mxu0 %v913_v0  ;;  %723 = vmatprep.subr.bf16.mxu1 %v913_v0 }
  0x53   :  { %680 = vmatmul.mubr.bf16.vlgmr.msra.gmra.mxu0 %v762_v15 }
  0x54   :  { %719 = vmatprep.mubr.msk.bf16.mxu0 %vm914_vm0, %v913_v0  ;;  %704 = vmatpush3.bf16.msra.mxu0 %v771_v18 }
  0x55   :  { %705 = vmatprep.subr.bf16.mxu0 %v913_v0 }
  0x58   :  { %706 = vmatpush3.bf16.msra.mxu0 %v772_v27 }
  0x59   :  { %707 = vmatprep.subr.bf16.mxu0 %v913_v0 }
  0x5c   :  { %708 = vmatpush3.bf16.msra.mxu0 %v773_v28 }
  0x5d   :  { %709 = vmatprep.subr.bf16.mxu0 %v913_v0 }
  0x60   :  { %710 = vmatpush3.bf16.msra.mxu0 %v774_v29 }
  0x61   :  { %711 = vmatprep.subr.bf16.mxu0 %v913_v0 }
  0x64   :  { %712 = vmatpush3.bf16.msra.mxu0 %v775_v30 }
  0x65   :  { %713 = vmatprep.subr.bf16.mxu0 %v913_v0 }
  0x68   :  { %714 = vmatpush3.bf16.msra.mxu0 %v776_v31 }
  0x69   :  { %715 = vmatprep.subr.bf16.mxu0 %v913_v0 }
  0x6c   :  { %716 = vmatpush3.bf16.msra.mxu0 %v777_v32 }
  0x6d   :  { %717 = vmatprep.subr.bf16.mxu0 %v913_v0 }
  0x70   :  { %718 = vmatpush3.bf16.msra.mxu0 %v778_v33 }
 0x113   :  { %v196_v19 = vpop.f32.mrf.mxu0 }
 0x114   :  { %v197_v23 = vadd.f32 %v589_v20, %v196_v19 }
 0x115   :  { %v681_v21 = vpop.f32.mrf.mxu0 }
 0x117   :  { %v199_v22 = vpop.f32.mrf.mxu0 }
 0x118   :  { %v200_v24 = vadd.f32 %v589_v20, %v199_v22 }
 0x119   :  { %v682_v25 = vpop.f32.mrf.mxu0 }
 0x11a   :  { %v203_v26 = vpack.c.bf16 %v200_v24, %v197_v23 }
 0x11c   :  { %700 = vmatmul.mubr.bf16.vlgmr.msra.gmra.mxu1 %v203_v26 }
 0x11d   :  { %739 = vmatprep.mubr.msk.bf16.mxu1 %vm914_vm0, %v913_v0  ;;  %724 = vmatpush3.bf16.msra.mxu1 %v779_v34 }
 0x11e   :  { %725 = vmatprep.subr.bf16.mxu1 %v913_v0 }
 0x121   :  { %726 = vmatpush3.bf16.msra.mxu1 %v780_v51 }
 0x122   :  { %727 = vmatprep.subr.bf16.mxu1 %v913_v0 }
 0x125   :  { %728 = vmatpush3.bf16.msra.mxu1 %v781_v52 }
 0x126   :  { %729 = vmatprep.subr.bf16.mxu1 %v913_v0 }
 0x129   :  { %730 = vmatpush3.bf16.msra.mxu1 %v782_v53 }
 0x12a   :  { %731 = vmatprep.subr.bf16.mxu1 %v913_v0 }
 0x12d   :  { %732 = vmatpush3.bf16.msra.mxu1 %v783_v54 }
 0x12e   :  { %733 = vmatprep.subr.bf16.mxu1 %v913_v0 }
 0x131   :  { %734 = vmatpush3.bf16.msra.mxu1 %v784_v55 }
 0x132   :  { %735 = vmatprep.subr.bf16.mxu1 %v913_v0 }
 0x135   :  { %736 = vmatpush3.bf16.msra.mxu1 %v785_v56 }
 0x136   :  { %737 = vmatprep.subr.bf16.mxu1 %v913_v0 }
 0x139   :  { %738 = vmatpush3.bf16.msra.mxu1 %v786_v57 }
 0x1dc   :  { %v309_v36 = vpop.f32.mrf.mxu1 }
 0x1dd   :  { %v310_v37 = vadd.f32 %v599_v35, %v309_v36 }
 0x1de   :  { %v701_v38 = vpop.f32.mrf.mxu1 }
 0x1df   :  { %v316_v39 = vmul.f32 0.5, %v310_v37 }
 0x1e0   :  { %v312_v40 = vpop.f32.mrf.mxu1 }
 0x1e1   :  { %787 = vtanh.f32 %v316_v39  ;;  %v313_v41 = vadd.f32 %v599_v35, %v312_v40 }
 0x1e2   :  { %v702_v42 = vpop.f32.mrf.mxu1 }
 0x1e3   :  { %v317_v43 = vmul.f32 0.5, %v313_v41 }
 0x1e5   :  { %789 = vtanh.f32 %v317_v43 }
 0x1ee   :  { %v788_v44 = vpop.eup %787 }
 0x1ef   :  { %v320_v45 = vadd.f32 1.0, %v788_v44 }
 0x1f1   :  { %v322_v48 = vmul.f32 0.5, %v320_v45 }
 0x1f2   :  { %v790_v46 = vpop.eup %789 }
 0x1f3   :  { %v321_v47 = vadd.f32 1.0, %v790_v46 }
 0x1f5   :  { %v323_v49 = vmul.f32 0.5, %v321_v47 }
 0x1f7   :  { %v324_v50 = vpack.c.bf16 %v323_v49, %v322_v48 }
 0x1f9   :  { %720 = vmatmul.mubr.bf16.vlgmr.msra.gmra.mxu0 %v324_v50 }
 0x2b9   :  { %v432_v59 = vpop.f32.mrf.mxu0 }
 0x2ba   :  { %v433_v60 = vadd.f32 %v609_v58, %v432_v59 }
 0x2bb   :  { %v721_v61 = vpop.f32.mrf.mxu0 }
 0x2bc   :  { %v439_v62 = vmul.f32 0.5, %v433_v60 }
 0x2bd   :  { %v435_v63 = vpop.f32.mrf.mxu0 }
 0x2be   :  { %791 = vtanh.f32 %v439_v62  ;;  %v436_v1 = vadd.f32 %v609_v58, %v435_v63 }
 0x2bf   :  { %v722_v2 = vpop.f32.mrf.mxu0 }
 0x2c0   :  { %v440_v3 = vmul.f32 0.5, %v436_v1 }
 0x2c2   :  { %793 = vtanh.f32 %v440_v3 }
 0x2cb   :  { %v792_v4 = vpop.eup %791 }
 0x2cc   :  { %v443_v5 = vadd.f32 1.0, %v792_v4 }
 0x2ce   :  { %v445_v7 = vmul.f32 0.5, %v443_v5 }
 0x2cf   :  { %v794_v6 = vpop.eup %793 }
 0x2d0   :  { %v444_v0 = vadd.f32 1.0, %v794_v6 }
 0x2d2   :  { %v446_v8 = vmul.f32 0.5, %v444_v0 }
 0x2d4   :  { %v447_v9 = vpack.c.bf16 %v446_v8, %v445_v7 }
 0x2d6   :  { %740 = vmatmul.mubr.bf16.vlgmr.msra.gmra.mxu1 %v447_v9 }
 0x396   :  { %v553_v11 = vpop.f32.mrf.mxu1 }
 0x397   :  { %v554_v12 = vadd.f32 %v618_v10, %v553_v11 }
 0x398   :  { %v741_v13 = vpop.f32.mrf.mxu1 }
 0x399   :  { %v560_v14 = vmul.f32 0.5, %v554_v12 }
 0x39a   :  { %v556_v15 = vpop.f32.mrf.mxu1 }
 0x39b   :  { %795 = vtanh.f32 %v560_v14  ;;  %v557_v16 = vadd.f32 %v618_v10, %v556_v15 }
 0x39c   :  { %v742_v17 = vpop.f32.mrf.mxu1 }
 0x39d   :  { %v561_v18 = vmul.f32 0.5, %v557_v16 }
 0x39f   :  { %797 = vtanh.f32 %v561_v18 }
 0x3a8   :  { %v796_v19 = vpop.eup %795 }
 0x3a9   :  { %v564_v20 = vadd.f32 1.0, %v796_v19 }
 0x3ab   :  { %v566_v21 = vmul.f32 0.5, %v564_v20 }
 0x3ac   :  { %v798_v22 = vpop.eup %797 }
 0x3ad   :  { %568 = vst [vmem:[#allocation10] sm:$0xff] %v566_v21  ;;  %v565_v23 = vadd.f32 1.0, %v798_v22 }
 0x3af   :  { %v567_v24 = vmul.f32 0.5, %v565_v23 }
 0x3b1   :  { %569 = vst [vmem:[#allocation10 + $0x8] sm:$0xff] %v567_v24 }
 0x3b2   :  { %890 = shalt.err (!%p887_p10)
}
 0x3b3   :  { %s916_s27 = smov 128   ;;  %s917_s28 = smov 8  }
 0x3b4   :  { %581 = dma.vmem_to_hbm [thread:$0]  %s576_s26, 256, %s1044_s7, [#allocation4], %s916_s27, %s916_s27, %s917_s28  }
 0x3b5   :  { %905 = dma.done.wait [#allocation4], 256  }
 0x3b6   :  { %906 = vsyncadd [#allocation4], 4294967040 }
 0x3b7   :  { %585 = vsyncpa [#allocation3], 1 }
 0x3b8   :  { %586 = vsyncpa [#allocation6], 1 }
 0x3b9   :  { %587 = vsyncpa [#allocation9], 1 }
 0x3ba   :  { %588 = vsyncpa [#allocation4], 1 }

</bundles_post_ra>
